<compile_context>
chip_gen: v7x
topology: tpu7x:2x2x1
jax: 0.10.0
libtpu: 0.0.40
codegen_flags: <defaults>
</compile_context>

<pallas_src>
import functools

import jax
import jax.numpy as jnp
from jax import lax
from jax.experimental import pallas as pl
from jax.experimental.pallas import tpu as pltpu


def _simclr_kernel(contrast_ref, out_ref, *, b, row_tile, inv_t):
    """One row tile of anchors against the full resident contrast block.

    contrast_ref: (2b, dim) resident in VMEM; rows [0, b) = view0 (anchors),
                  rows [b, 2b) = view1.  bf16 or f32.
    out_ref:      (row_tile, 1) f32 per-anchor loss block.
    """
    row0 = pl.multiple_of(pl.program_id(0) * row_tile, row_tile)
    v_row0 = pl.multiple_of(pl.program_id(0) * row_tile + b, row_tile)

    anchor = contrast_ref[pl.ds(row0, row_tile), :]       # (TM, dim)
    view1 = contrast_ref[pl.ds(v_row0, row_tile), :]      # (TM, dim)

    # similarity logits on the MXU: (TM, dim) . (2b, dim)^T -> (TM, 2b),
    # f32 accumulation; 1/T applied once to the f32 result.
    logits = lax.dot_general(
        anchor, contrast_ref[...],
        dimension_numbers=(((1,), (1,)), ((), ())),
        preferred_element_type=jnp.float32,
    ) * inv_t                                             # (TM, 2b) f32

    a32 = anchor.astype(jnp.float32)
    v32 = view1.astype(jnp.float32)
    # positive logit <anchor_i, view1_i>/T computed directly, and the analytic
    # self logit <anchor_i, anchor_i>/T (replaces the iota/compare/select mask
    # over the (TM, 2b) slab with (TM, dim) VPU work).
    pos = inv_t * jnp.sum(a32 * v32, axis=1, keepdims=True)         # (TM, 1)
    self_logit = inv_t * jnp.sum(a32 * a32, axis=1, keepdims=True)  # (TM, 1)

    # numerically stable softmax: row max over the FULL row (incl. the self
    # column), exactly like the reference; self excluded from the denominator.
    row_max = jnp.max(logits, axis=1, keepdims=True)                # (TM, 1)
    denom = (jnp.sum(jnp.exp(logits - row_max), axis=1, keepdims=True)
             - jnp.exp(self_logit - row_max))                       # (TM, 1)

    # loss_i = -log_prob at the single positive column (i + b)
    out_ref[...] = -(pos - row_max - jnp.log(denom))


def simclr_loss_pallas(features, temperature, *, row_tile=None, use_bf16=True):
    """features: f32[b, 2, dim] -> scalar f32 loss (matches SimCLRLoss.forward)."""
    b, n, dim = features.shape
    assert n == 2

    if row_tile is None:
        for cand in (256, 128, 64, 32, 16, 8):
            if b % cand == 0:
                row_tile = cand
                break
        else:
            # TODO(synk): cdiv grid + masked tail instead of one giant tile.
            row_tile = b
        # v7x has two TensorCores: give the "parallel" row axis >= 2 steps when
        # the batch allows it (no-op on single-TC v5e/v6e).
        if b // row_tile == 1 and row_tile % 32 == 0:
            row_tile //= 2
    assert b % row_tile == 0, "row_tile must divide b"

    # bf16 MXU operands only when the in-kernel sublane slices stay aligned to
    # bf16's 2-row packing; otherwise keep f32 (still correct, just slower).
    bf16_ok = use_bf16 and (row_tile % 16 == 0) and (b % 16 == 0)
    cdtype = jnp.bfloat16 if bf16_ok else jnp.float32

    # contrast = [view0; view1], natural (2b, dim) row-major layout: one fused
    # XLA transpose(+cast) pass. No (dim, 2b) transpose, no separate anchor /
    # view1 copies, no 1/T pre-scale pass in the wrapper.
    contrast = jnp.swapaxes(features, 0, 1).reshape(2 * b, dim).astype(cdtype)

    inv_t = float(1.0 / float(temperature))
    grid = (b // row_tile,)

    per_anchor = pl.pallas_call(
        functools.partial(_simclr_kernel, b=b, row_tile=row_tile, inv_t=inv_t),
        out_shape=jax.ShapeDtypeStruct((b, 1), jnp.float32),
        grid=grid,
        in_specs=[
            # grid-invariant contrast block: whole array resident in VMEM as a
            # single buffer (no double-buffering of an unchanging block).
            pl.BlockSpec(memory_space=pltpu.MemorySpace.VMEM),
        ],
        out_specs=pl.BlockSpec((row_tile, 1), lambda i: (i, 0)),
        compiler_params=pltpu.CompilerParams(
            dimension_semantics=("parallel",),
            vmem_limit_bytes=64 * 1024 * 1024,
        ),
    )(contrast)

    # tiny (b, 1) -> scalar mean finished in the wrapper
    return jnp.mean(per_anchor)


def simclr_loss_ref(features, temperature):
    """Pure-JAX reference, line-for-line port of the PyTorch module."""
    b, n, dim = features.shape
    assert n == 2
    mask = jnp.eye(b, dtype=jnp.float32)
    contrast = jnp.concatenate([features[:, 0], features[:, 1]], axis=0)
    anchor = features[:, 0]
    dot = jnp.matmul(anchor, contrast.T) / temperature
    logits_max = jnp.max(dot, axis=1, keepdims=True)
    logits = dot - logits_max
    mask = jnp.tile(mask, (1, 2))
    logits_mask = jnp.ones_like(mask).at[jnp.arange(b), jnp.arange(b)].set(0.0)
    mask = mask * logits_mask
    exp_logits = jnp.exp(logits) * logits_mask
    log_prob = logits - jnp.log(jnp.sum(exp_logits, axis=1, keepdims=True))
    loss = -jnp.mean(jnp.sum(mask * log_prob, axis=1) / jnp.sum(mask, axis=1))
    return loss


if __name__ == "__main__":
    key = jax.random.PRNGKey(0)
    b, dim = 16, 128
    temperature = 0.5
    features = jax.random.normal(key, (b, 2, dim), dtype=jnp.float32)
    # SimCLR consumes L2-normalized projections.  Unnormalized gaussians at
    # dim=128 make the *reference* itself NaN (self-similarity ~dim/T dominates
    # and every other exp underflows), so the test uses the module's intended
    # input domain.
    features = features / jnp.linalg.norm(features, axis=-1, keepdims=True)

    ref = simclr_loss_ref(features, temperature)

    # f32 path: exact-semantics check at tight tolerance.
    loss_f32 = simclr_loss_pallas(features, temperature, use_bf16=False)
    jax.block_until_ready(loss_f32)
    assert jnp.allclose(loss_f32, ref, rtol=1e-4, atol=1e-4), (loss_f32, ref)

    # default bf16-MXU path: bf16 operands, f32 accumulation / softmax math.
    loss = simclr_loss_pallas(features, temperature)
    jax.block_until_ready(loss)
    assert jnp.allclose(loss, ref, rtol=5e-3, atol=5e-3), (loss, ref)

    print("KERNEL_OK")
</pallas_src>

<mosaic_0001>
module attributes {stable_mosaic.version = 11 : i64} {
  func.func @_simclr_kernel(%arg0: i32, %arg1: memref<32x128xf32, #tpu.memory_space<vmem>>, %arg2: memref<16x1xf32, #tpu.memory_space<vmem>>) attributes {dimension_semantics = [#tpu.dimension_semantics<parallel>], iteration_bounds = array<i64: 1>, scalar_prefetch = 0 : i64, scratch_operands = 0 : i64, tpu.core_type = #tpu.core_type<tc>, window_params = [{pipeline_mode = #tpu.pipeline_mode<synchronous>, transform_indices = @transform_0, window_bounds = array<i64: 32, 128>}, {transform_indices = @transform_1, window_bounds = array<i64: 16, 1>}]} {
    %c16_i32 = arith.constant 16 : i32
    %0 = arith.muli %arg0, %c16_i32 : i32
    %1 = tpu.assume_multiple %0, 16 : i32
    %c16_i32_0 = arith.constant 16 : i32
    %2 = arith.muli %arg0, %c16_i32_0 : i32
    %c16_i32_1 = arith.constant 16 : i32
    %3 = arith.addi %2, %c16_i32_1 : i32
    %4 = tpu.assume_multiple %3, 16 : i32
    %5 = arith.index_cast %1 : i32 to index
    %c0 = arith.constant 0 : index
    %6 = vector.load %arg1[%5, %c0] : memref<32x128xf32, #tpu.memory_space<vmem>>, vector<16x128xf32>
    %7 = arith.index_cast %4 : i32 to index
    %c0_2 = arith.constant 0 : index
    %8 = vector.load %arg1[%7, %c0_2] : memref<32x128xf32, #tpu.memory_space<vmem>>, vector<16x128xf32>
    %c0_3 = arith.constant 0 : index
    %c0_4 = arith.constant 0 : index
    %9 = vector.load %arg1[%c0_3, %c0_4] : memref<32x128xf32, #tpu.memory_space<vmem>>, vector<32x128xf32>
    %cst = arith.constant dense<0.000000e+00> : vector<16x32xf32>
    %10 = tpu.matmul %6, %9, %cst {dimension_numbers = #tpu.dot_dimension_numbers<[1], [1], [0], [0], [0, 0, 1, 0], [], []>} : vector<16x128xf32>, vector<32x128xf32>, vector<16x32xf32> -> vector<16x32xf32>
    %cst_5 = arith.constant 2.000000e+00 : f32
    %11 = vector.broadcast %cst_5 : f32 to vector<16x32xf32>
    %12 = arith.mulf %10, %11 : vector<16x32xf32>
    %13 = arith.mulf %6, %8 : vector<16x128xf32>
    %cst_6 = arith.constant dense<0.000000e+00> : vector<16xf32>
    %14 = vector.multi_reduction <add>, %13, %cst_6 [1] : vector<16x128xf32> to vector<16xf32>
    %15 = vector.shape_cast %14 : vector<16xf32> to vector<16x1xf32>
    %cst_7 = arith.constant 2.000000e+00 : f32
    %16 = vector.broadcast %cst_7 : f32 to vector<16x1xf32>
    %17 = arith.mulf %16, %15 : vector<16x1xf32>
    %18 = arith.mulf %6, %6 : vector<16x128xf32>
    %cst_8 = arith.constant dense<0.000000e+00> : vector<16xf32>
    %19 = vector.multi_reduction <add>, %18, %cst_8 [1] : vector<16x128xf32> to vector<16xf32>
    %20 = vector.shape_cast %19 : vector<16xf32> to vector<16x1xf32>
    %cst_9 = arith.constant 2.000000e+00 : f32
    %21 = vector.broadcast %cst_9 : f32 to vector<16x1xf32>
    %22 = arith.mulf %21, %20 : vector<16x1xf32>
    %cst_10 = arith.constant dense<0xFF800000> : vector<16xf32>
    %23 = vector.multi_reduction <maximumf>, %12, %cst_10 [1] : vector<16x32xf32> to vector<16xf32>
    %24 = vector.shape_cast %23 : vector<16xf32> to vector<16x1xf32>
    %25 = vector.broadcast %24 : vector<16x1xf32> to vector<16x32xf32>
    %26 = arith.subf %12, %25 : vector<16x32xf32>
    %27 = math.exp %26 : vector<16x32xf32>
    %cst_11 = arith.constant dense<0.000000e+00> : vector<16xf32>
    %28 = vector.multi_reduction <add>, %27, %cst_11 [1] : vector<16x32xf32> to vector<16xf32>
    %29 = vector.shape_cast %28 : vector<16xf32> to vector<16x1xf32>
    %30 = arith.subf %22, %24 : vector<16x1xf32>
    %31 = math.exp %30 : vector<16x1xf32>
    %32 = arith.subf %29, %31 : vector<16x1xf32>
    %33 = arith.subf %17, %24 : vector<16x1xf32>
    %34 = math.log %32 : vector<16x1xf32>
    %35 = arith.subf %33, %34 : vector<16x1xf32>
    %cst_12 = arith.constant 0.000000e+00 : f32
    %36 = vector.broadcast %cst_12 : f32 to vector<16x1xf32>
    %37 = arith.subf %36, %35 : vector<16x1xf32>
    %c0_13 = arith.constant 0 : index
    %c0_14 = arith.constant 0 : index
    %38 = vector.load %arg2[%c0_13, %c0_14] : memref<16x1xf32, #tpu.memory_space<vmem>>, vector<16x1xf32>
    tpu.vector_store %arg2[%c0_13, %c0_14], %37 {strides = array<i32>} : memref<16x1xf32, #tpu.memory_space<vmem>>, vector<16x1xf32>,
    return
  }
  func.func @transform_0(%arg0: i32) -> (i32, i32) {
    %c0_i32 = arith.constant 0 : i32
    %c0_i32_0 = arith.constant 0 : i32
    %c0_i32_1 = arith.constant 0 : i32
    return %c0_i32, %c0_i32_0 : i32, i32
  }
  func.func @transform_1(%arg0: i32) -> (i32, i32) {
    %c0_i32 = arith.constant 0 : i32
    %c0_i32_0 = arith.constant 0 : i32
    return %arg0, %c0_i32 : i32, i32
  }
}

</mosaic_0001>

<bundles_post_ra>
// kernel: tpu_custom_call.1
= control target key start
LH: loop header
LB: loop body
LE: loop exit
PB: predicated region body
PF: predicated region fallthrough
CT: control target
= control target key end

     0   :  { %6 = vsyncpa [#allocation3], 0  ;;  %s323_s0 = inlined_call_operand.hbm [shape: f32[32,128], index: 0, kind: input, shape index: {}]   ;;  %s324_s1 = inlined_call_operand.hbm [shape: f32[16,1], index: 1, kind: output, shape index: {}]  }
   0x1   :  { %7 = vsyncpa [#allocation4], 0  ;;  %s275_s6 = smov [#allocation2]   ;;  %s227_s10 = scalar_lea.hbm %s323_s0, 512 }
   0x2   :  { %s13_s7 = sshll.u32 %s275_s6, 4  ;;  %p228_p0 = scmp.ne.s32.totalorder %s323_s0, %s227_s10  ;;  %s14_s7 = int_to_ptr.vmem [resolvable:$true] %s13_s7 }
   0x3   :  { %p231_p1 = scmp.lt.u32.totalorder %s227_s10, %s323_s0 }
   0x5   :  { %p233_p2 = pnand %p231_p1, %p228_p0 }
   0x7   :  { %236 = shalt.err (!%p233_p2)
}
   0x8   :  { %s237_s15 = scalar_lea.vmem %s14_s7, 512  ;;  %p242_p4 = scmp.lt.s32.totalorder %s14_s7, %s14_s7 }
   0x9   :  { %p238_p3 = scmp.ne.s32.totalorder %s14_s7, %s237_s15  ;;  %p243_p5 = scmp.lt.s32.totalorder %s237_s15, %s237_s15 }
   0xb   :  { %p244_p6 = por %p243_p5, %p242_p4 }
   0xd   :  { %p245_p7 = pnand %p244_p6, %p238_p3 }
   0xf   :  { %248 = shalt.err (!%p245_p7)
}
  0x10   :  { %s276_s16 = smov 128   ;;  %s277_s17 = smov 8  }
  0x11   :  { %19 = dma.hbm_to_vmem [thread:$0]  %s323_s0, 512, %s14_s7, [#allocation3], %s276_s16, %s276_s16, %s277_s17  }
  0x12   :  { %271 = dma.done.wait [#allocation3], 512  }
  0x13   :  { %272 = vsyncadd [#allocation3], 4294966784  ;;  %v31_v0 = vld [vmem:[#allocation2] sm:$0xff]  ;;  %v32_v1 = vld [vmem:[#allocation2 + $0x8] sm:$0xff]  ;;  %vm128_vm0 = vcmask 261120   ;;  %vm165_vm1 = vcmask 7168  }
  0x14   :  { %v33_v2 = vld [vmem:[#allocation2 + $0x10] sm:$0xff]  ;;  %v203_v3 = vpack.c.bf16 %v32_v1, %v31_v0  ;;  %v34_v4 = vld [vmem:[#allocation2 + $0x18] sm:$0xff]  ;;  %200 = vmatprep.mubr.f32.mxu0 %v31_v0  ;;  %v120_v6 = vmul.f32 %v31_v0, %v31_v0  ;;  %v121_v7 = vmul.f32 %v32_v1, %v32_v1  ;;  %s278_s0 = smov [#allocation5]  }
  0x15   :  { %v207_v5 = vpack.c.bf16 %v34_v4, %v33_v2  ;;  %v112_v22 = vmul.f32 %v33_v2, %v31_v0  ;;  %v113_v25 = vmul.f32 %v34_v4, %v32_v1  ;;  %s173_s20 = sshll.u32 %s278_s0, 4  ;;  %s174_s20 = int_to_ptr.vmem [resolvable:$true] %s173_s20 }
  0x16   :  { %204 = vmatprep.subr.bf16.mxu0 %v203_v3  ;;  %122 = vadd.xlane.f32.xlu1 %v120_v6  ;;  %s249_s21 = scalar_lea.vmem %s174_s20, 256  ;;  %p254_p9 = scmp.lt.s32.totalorder %s174_s20, %s174_s20 }
  0x17   :  { %206 = vmatpush3.bf16.xpose.msra.mxu0 %v203_v3  ;;  %p250_p8 = scmp.ne.s32.totalorder %s174_s20, %s249_s21  ;;  %p255_p10 = scmp.lt.s32.totalorder %s249_s21, %s249_s21 }
  0x18   :  { %208 = vmatprep.subr.bf16.mxu0 %v207_v5 }
  0x19   :  { %p256_p11 = por %p255_p10, %p254_p9 }
  0x1a   :  { %124 = vadd.xlane.f32.xlu1 %v121_v7 }
  0x1b   :  { %p257_p12 = pnand %p256_p11, %p250_p8 }
  0x1f   :  { %210 = vmatpush3.bf16.xpose.msra.mxu0 %v207_v5 }
  0x26   :  { %201 = vmatmul.mubr.f32.vlgmr.msra.gmra.mrb[0].mxu0 %v32_v1 }
  0xa3   :  { %v123_v26 = vpop.xlane.xlu1 %122 }
  0xa4   :  { %v126_v27 = vmul.f32 2.0, %v123_v26 }
  0xa7   :  { %v125_v28 = vpop.xlane.xlu1 %124 }
  0xa8   :  { %v127_v30 = vmul.f32 2.0, %v125_v28 }
  0xf9   :  { %v202_v8 = vpop.f32.mrb[0].mxu0 }
  0xfa   :  { %v101_v9 = vpop.f32.mrb[1].mxu0  ;;  %v111_v11 = vmul.f32 2.0, %v202_v8 }
  0xfb   :  { %v110_v10 = vmul.f32 2.0, %v101_v9 }
  0xfc   :  { %v132_v13 = vsel %vm128_vm0, %v111_v11, -inf }
  0xfd   :  { %v129_v12 = vsel %vm128_vm0, %v110_v10, -inf }
  0xfe   :  { %130 = vmax.xlane.f32.xlu0 %v129_v12 }
 0x102   :  { %133 = vmax.xlane.f32.xlu0 %v132_v13 }
 0x18b   :  { %v131_v14 = vpop.xlane.xlu0 %130 }
 0x18c   :  { %v135_v15 = vsub.f32 %v110_v10, %v131_v14  ;;  %v147_v29 = vsub.f32 %v126_v27, %v131_v14 }
 0x18e   :  { %v137_v16 = vmul.f32 1.442695, %v135_v15  ;;  %v149_v31 = vmul.f32 1.442695, %v147_v29 }
 0x18f   :  { %v134_v17 = vpop.xlane.xlu0 %133 }
 0x190   :  { %215 = vpow2.f32 %v137_v16  ;;  %v136_v18 = vsub.f32 %v111_v11, %v134_v17  ;;  %v148_v32 = vsub.f32 %v127_v30, %v134_v17 }
 0x192   :  { %v139_v19 = vmul.f32 1.442695, %v136_v18  ;;  %v151_v33 = vmul.f32 1.442695, %v148_v32 }
 0x194   :  { %217 = vpow2.f32 %v139_v19 }
 0x195   :  { %219 = vpow2.f32 %v149_v31 }
 0x196   :  { %221 = vpow2.f32 %v151_v33 }
 0x19a   :  { %v216_v20 = vpop.eup %215 }
 0x19b   :  { %v141_v21 = vsel %vm128_vm0, %v216_v20, 0.0 }
 0x19c   :  { %142 = vadd.xlane.f32.xlu0 %v141_v21 }
 0x19e   :  { %v218_v23 = vpop.eup %217 }
 0x19f   :  { %v144_v24 = vsel %vm128_vm0, %v218_v23, 0.0  ;;  %v220_v34 = vpop.eup %219 }
 0x1a0   :  { %114 = vadd.xlane.f32.xlu0 %v112_v22  ;;  %145 = vadd.xlane.f32.xlu1 %v144_v24  ;;  %v222_v37 = vpop.eup %221 }
 0x1a4   :  { %116 = vadd.xlane.f32.xlu1 %v113_v25 }
 0x229   :  { %v143_v35 = vpop.xlane.xlu0 %142 }
 0x22a   :  { %v153_v36 = vsub.f32 %v143_v35, %v220_v34 }
 0x22c   :  { %223 = vlog2.f32 %v153_v36 }
 0x22d   :  { %v146_v38 = vpop.xlane.xlu1 %145  ;;  %v115_v40 = vpop.xlane.xlu0 %114 }
 0x22e   :  { %v154_v39 = vsub.f32 %v146_v38, %v222_v37  ;;  %v118_v41 = vmul.f32 2.0, %v115_v40 }
 0x230   :  { %225 = vlog2.f32 %v154_v39  ;;  %v155_v45 = vsub.f32 %v118_v41, %v131_v14 }
 0x231   :  { %v117_v42 = vpop.xlane.xlu1 %116 }
 0x232   :  { %v119_v46 = vmul.f32 2.0, %v117_v42 }
 0x234   :  { %v156_v51 = vsub.f32 %v119_v46, %v134_v17 }
 0x236   :  { %v224_v43 = vpop.eup %223 }
 0x237   :  { %v158_v44 = vmul.f32 0.6931472, %v224_v43 }
 0x239   :  { %v161_v47 = vsub.f32 %v155_v45, %v158_v44 }
 0x23a   :  { %v226_v48 = vpop.eup %225 }
 0x23b   :  { %v160_v49 = vmul.f32 0.6931472, %v226_v48  ;;  %v163_v50 = vsub.f32 0.0, %v161_v47 }
 0x23d   :  { %v162_v52 = vsub.f32 %v156_v51, %v160_v49  ;;  %166 = vst.msk [vmem:[#allocation5] sm:$0xff] %vm165_vm1, %v163_v50 }
 0x23f   :  { %v164_v53 = vsub.f32 0.0, %v162_v52 }
 0x241   :  { %167 = vst.msk [vmem:[#allocation5 + $0x8] sm:$0xff] %vm165_vm1, %v164_v53 }
 0x242   :  { %260 = shalt.err (!%p257_p12)
}
 0x243   :  { %s261_s24 = scalar_lea.hbm %s324_s1, 256 }
 0x244   :  { %p262_p13 = scmp.ne.s32.totalorder %s324_s1, %s261_s24  ;;  %p265_p0 = scmp.lt.u32.totalorder %s261_s24, %s324_s1 }
 0x246   :  { %p267_p1 = pnand %p265_p0, %p262_p13 }
 0x248   :  { %270 = shalt.err (!%p267_p1)
}
 0x249   :  { %179 = dma.vmem_to_hbm [thread:$0]  %s174_s20, 256, %s324_s1, [#allocation4], %s276_s16, %s276_s16, %s277_s17  }
 0x24a   :  { %273 = dma.done.wait [#allocation4], 256  }
 0x24b   :  { %274 = vsyncadd [#allocation4], 4294967040 }
 0x24c   :  { %183 = vsyncpa [#allocation3], 1 }
 0x24d   :  { %184 = vsyncpa [#allocation4], 1 }

</bundles_post_ra>
